<compile_context>
chip_gen: v7x
topology: tpu7x:2x2x1
jax: 0.10.0
libtpu: 0.0.40
codegen_flags: <defaults>
</compile_context>

<pallas_src>
import functools

import jax
import jax.numpy as jnp
import numpy as np
from jax.experimental import pallas as pl
from jax.experimental.pallas import tpu as pltpu

NUM_EMBEDDINGS = 512
EMBEDDING_DIM = 64
BETA = 0.25

_TM_MAX = 512


def _round_up(x, m):
    return ((x + m - 1) // m) * m


def _choose_tm(M):
    if M <= 256:
        return _round_up(M, 8)                 # one small tile
    if M <= 2 * _TM_MAX:
        return _round_up((M + 1) // 2, 256)    # >=2 grid steps (v7x megacore)
    return _TM_MAX                             # cap temporaries (v5e VMEM budget)


def _vq_kernel(z_ref, et_ref, e_ref, ebias_ref, zq_ref, idx_ref, loss_ref, *, m_total):
    z = z_ref[...]                         # (TM, D) f32
    e_t = et_ref[...]                      # (D, K)  f32, pre-transposed codebook
    e_bias = ebias_ref[...]                # (1, K)  f32, 0.5 * ||E||^2

    TM = z.shape[0]
    K = e_t.shape[1]

    # q[m,k] = <z[m], e[k]> - 0.5*||e[k]||^2 ; argmax_k q == argmin_k ||z[m]-e[k]||^2
    scores = jnp.dot(z, e_t, preferred_element_type=jnp.float32)   # (TM, K) MXU
    q = scores - e_bias                                            # (TM, K)

    col = jax.lax.broadcasted_iota(jnp.int32, (1, K), 1)           # (1, K) lane iota
    q_max = jnp.max(q, axis=-1, keepdims=True)                     # (TM, 1)
    # first index achieving the max (matches torch.argmin tie-break on dist)
    idx = jnp.min(jnp.where(q >= q_max, col, K),
                  axis=-1, keepdims=True)                          # (TM, 1) int32
    idx_ref[...] = idx

    # gather codebook rows via one-hot matmul on the MXU (exact: 0/1 weights, f32 codebook)
    one_hot = (col == idx).astype(jnp.float32)                     # (TM, K)
    z_q = jnp.dot(one_hot, e_ref[...],
                  preferred_element_type=jnp.float32)              # (TM, D)
    zq_ref[...] = z_q

    # fused partial loss: sum over valid (non-padded) rows of ||z_q - z||^2
    diff = z_q - z
    row_sq = jnp.sum(diff * diff, axis=-1, keepdims=True)          # (TM, 1)
    row_id = (pl.program_id(0) * TM
              + jax.lax.broadcasted_iota(jnp.int32, (TM, 1), 0))   # global row ids
    masked = jnp.where(row_id < m_total, row_sq, 0.0)              # (TM, 1)
    tile_sum = jnp.sum(masked, axis=0, keepdims=True)              # (1, 1)
    loss_ref[...] = jnp.broadcast_to(tile_sum.reshape(1, 1, 1), (1, 8, 128))


@functools.partial(jax.jit, static_argnames=("beta",))
def vector_quantizer(z, embedding, beta=BETA):
    """Returns (z_q, loss, indices) with the same forward values as the PyTorch module."""
    B, N, D = z.shape
    K = embedding.shape[0]
    M = B * N

    flat = z.reshape(M, D).astype(jnp.float32)
    emb = embedding.astype(jnp.float32)

    TM = _choose_tm(M)
    M_pad = _round_up(M, TM)
    if M_pad > M:
        flat = jnp.pad(flat, ((0, M_pad - M), (0, 0)))

    e_t = emb.T                                                    # (D, K) for scores matmul
    e_bias = 0.5 * jnp.sum(emb * emb, axis=1, keepdims=True).T     # (1, K)

    num_tiles = M_pad // TM
    kernel = functools.partial(_vq_kernel, m_total=M)

    zq_flat, idx_flat, loss_parts = pl.pallas_call(
        kernel,
        out_shape=(jax.ShapeDtypeStruct((M_pad, D), jnp.float32),
                   jax.ShapeDtypeStruct((M_pad, 1), jnp.int32),
                   jax.ShapeDtypeStruct((num_tiles, 8, 128), jnp.float32)),
        grid=(num_tiles,),
        in_specs=[
            pl.BlockSpec((TM, D), lambda i: (i, 0)),               # z rows (tiled)
            pl.BlockSpec((D, K), lambda i: (0, 0)),                # codebook^T (resident)
            pl.BlockSpec((K, D), lambda i: (0, 0)),                # codebook   (resident)
            pl.BlockSpec((1, K), lambda i: (0, 0)),                # 0.5*||E||^2 (resident)
        ],
        out_specs=(
            pl.BlockSpec((TM, D), lambda i: (i, 0)),               # z_q rows
            pl.BlockSpec((TM, 1), lambda i: (i, 0)),               # indices
            pl.BlockSpec((1, 8, 128), lambda i: (i, 0, 0)),        # per-tile loss partial
        ),
        compiler_params=pltpu.CompilerParams(
            dimension_semantics=("parallel",),
            vmem_limit_bytes=32 * 1024 * 1024),
    )(flat, e_t, emb, e_bias)

    z_q = zq_flat[:M].reshape(B, N, D)
    indices = idx_flat[:M, 0].reshape(B, N)
    loss = (1.0 + beta) * jnp.sum(loss_parts[:, 0, 0]) / (M * D)
    return z_q, loss, indices


if __name__ == "__main__":
    key = jax.random.PRNGKey(0)
    k_z, k_e = jax.random.split(key)

    B, N, D, K = 2, 8, EMBEDDING_DIM, NUM_EMBEDDINGS
    z = jax.random.normal(k_z, (B, N, D), dtype=jnp.float32)
    embedding = jax.random.uniform(
        k_e, (K, D), dtype=jnp.float32,
        minval=-1.0 / K, maxval=1.0 / K)                           # matches uniform_(-1/K, 1/K)

    z_q, loss, indices = vector_quantizer(z, embedding)
    z_q = jax.block_until_ready(z_q)
    loss = jax.block_until_ready(loss)
    indices = jax.block_until_ready(indices)

    assert z_q.shape == (B, N, D)
    assert indices.shape == (B, N)

    # Float64 host reference (tolerates f32 near-tie index ambiguity).
    z64 = np.asarray(z, dtype=np.float64).reshape(-1, D)
    e64 = np.asarray(embedding, dtype=np.float64)
    dist = (z64 ** 2).sum(1, keepdims=True) - 2.0 * z64 @ e64.T + (e64 ** 2).sum(1)
    ref_idx = dist.argmin(1)

    kidx = np.asarray(indices).reshape(-1)
    assert kidx.min() >= 0 and kidx.max() < K
    # The kernel's chosen code must achieve (near-)minimal distance for every row.
    gap = dist[np.arange(kidx.shape[0]), kidx] - dist.min(axis=1)
    assert np.all(gap <= 1e-5), f"non-optimal code selected, max gap={gap.max()}"

    # z_q must be the selected codebook rows.
    np.testing.assert_allclose(np.asarray(z_q).reshape(-1, D),
                               np.asarray(embedding)[kidx],
                               atol=1e-6, rtol=1e-6)

    # Loss matches the reference forward value.
    ref_zq = e64[ref_idx].reshape(B, N, D)
    ref_loss = (1.0 + BETA) * np.mean((ref_zq - np.asarray(z, dtype=np.float64)) ** 2)
    np.testing.assert_allclose(float(loss), float(ref_loss), atol=1e-6, rtol=1e-5)

    print("KERNEL_OK")
</pallas_src>

<mosaic_0001>
module attributes {stable_mosaic.version = 11 : i64} {
  func.func @_vq_kernel(%arg0: i32, %arg1: memref<16x64xf32, #tpu.memory_space<vmem>>, %arg2: memref<64x512xf32, #tpu.memory_space<vmem>>, %arg3: memref<512x64xf32, #tpu.memory_space<vmem>>, %arg4: memref<1x512xf32, #tpu.memory_space<vmem>>, %arg5: memref<16x64xf32, #tpu.memory_space<vmem>>, %arg6: memref<16x1xi32, #tpu.memory_space<vmem>>, %arg7: memref<1x8x128xf32, #tpu.memory_space<vmem>>) attributes {dimension_semantics = [#tpu.dimension_semantics<parallel>], iteration_bounds = array<i64: 1>, scalar_prefetch = 0 : i64, scratch_operands = 0 : i64, tpu.core_type = #tpu.core_type<tc>, window_params = [{transform_indices = @transform_0, window_bounds = array<i64: 16, 64>}, {pipeline_mode = #tpu.pipeline_mode<synchronous>, transform_indices = @transform_1, window_bounds = array<i64: 64, 512>}, {pipeline_mode = #tpu.pipeline_mode<synchronous>, transform_indices = @transform_2, window_bounds = array<i64: 512, 64>}, {pipeline_mode = #tpu.pipeline_mode<synchronous>, transform_indices = @transform_3, window_bounds = array<i64: 1, 512>}, {transform_indices = @transform_4, window_bounds = array<i64: 16, 64>}, {transform_indices = @transform_5, window_bounds = array<i64: 16, 1>}, {transform_indices = @transform_6, window_bounds = array<i64: 1, 8, 128>}]} {
    %c0 = arith.constant 0 : index
    %c0_0 = arith.constant 0 : index
    %0 = vector.load %arg1[%c0, %c0_0] : memref<16x64xf32, #tpu.memory_space<vmem>>, vector<16x64xf32>
    %c0_1 = arith.constant 0 : index
    %c0_2 = arith.constant 0 : index
    %1 = vector.load %arg2[%c0_1, %c0_2] : memref<64x512xf32, #tpu.memory_space<vmem>>, vector<64x512xf32>
    %c0_3 = arith.constant 0 : index
    %c0_4 = arith.constant 0 : index
    %2 = vector.load %arg4[%c0_3, %c0_4] : memref<1x512xf32, #tpu.memory_space<vmem>>, vector<1x512xf32>
    %cst = arith.constant dense<0.000000e+00> : vector<16x512xf32>
    %3 = tpu.matmul %0, %1, %cst {dimension_numbers = #tpu.dot_dimension_numbers<[1], [0], [0], [1], [0, 0, 1, 1], [], []>} : vector<16x64xf32>, vector<64x512xf32>, vector<16x512xf32> -> vector<16x512xf32>
    %4 = vector.broadcast %2 : vector<1x512xf32> to vector<16x512xf32>
    %5 = arith.subf %3, %4 : vector<16x512xf32>
    %6 = tpu.iota {dimensions = array<i32: 1>} : vector<1x512xi32>
    %cst_5 = arith.constant dense<0xFF800000> : vector<16xf32>
    %7 = vector.multi_reduction <maximumf>, %5, %cst_5 [1] : vector<16x512xf32> to vector<16xf32>
    %8 = vector.shape_cast %7 : vector<16xf32> to vector<16x1xf32>
    %9 = vector.broadcast %8 : vector<16x1xf32> to vector<16x512xf32>
    %10 = arith.cmpf oge, %5, %9 : vector<16x512xf32>
    %c512_i32 = arith.constant 512 : i32
    %11 = vector.shape_cast %6 : vector<1x512xi32> to vector<1x512xi32>
    %12 = vector.broadcast %11 : vector<1x512xi32> to vector<16x512xi32>
    %13 = vector.broadcast %c512_i32 : i32 to vector<16x512xi32>
    %14 = arith.select %10, %12, %13 : vector<16x512xi1>, vector<16x512xi32>
    %cst_6 = arith.constant dense<2147483647> : vector<16xi32>
    %15 = vector.multi_reduction <minsi>, %14, %cst_6 [1] : vector<16x512xi32> to vector<16xi32>
    %16 = vector.shape_cast %15 : vector<16xi32> to vector<16x1xi32>
    %c0_7 = arith.constant 0 : index
    %c0_8 = arith.constant 0 : index
    %17 = vector.load %arg6[%c0_7, %c0_8] : memref<16x1xi32, #tpu.memory_space<vmem>>, vector<16x1xi32>
    tpu.vector_store %arg6[%c0_7, %c0_8], %16 {strides = array<i32>} : memref<16x1xi32, #tpu.memory_space<vmem>>, vector<16x1xi32>,
    %18 = vector.broadcast %6 : vector<1x512xi32> to vector<16x512xi32>
    %19 = vector.broadcast %16 : vector<16x1xi32> to vector<16x512xi32>
    %20 = arith.cmpi eq, %18, %19 : vector<16x512xi32>
    %21 = arith.extui %20 : vector<16x512xi1> to vector<16x512xi32>
    %22 = arith.sitofp %21 : vector<16x512xi32> to vector<16x512xf32>
    %c0_9 = arith.constant 0 : index
    %c0_10 = arith.constant 0 : index
    %23 = vector.load %arg3[%c0_9, %c0_10] : memref<512x64xf32, #tpu.memory_space<vmem>>, vector<512x64xf32>
    %cst_11 = arith.constant dense<0.000000e+00> : vector<16x64xf32>
    %24 = tpu.matmul %22, %23, %cst_11 {dimension_numbers = #tpu.dot_dimension_numbers<[1], [0], [0], [1], [0, 0, 1, 1], [], []>} : vector<16x512xf32>, vector<512x64xf32>, vector<16x64xf32> -> vector<16x64xf32>
    %c0_12 = arith.constant 0 : index
    %c0_13 = arith.constant 0 : index
    %25 = vector.load %arg5[%c0_12, %c0_13] : memref<16x64xf32, #tpu.memory_space<vmem>>, vector<16x64xf32>
    tpu.vector_store %arg5[%c0_12, %c0_13], %24 {strides = array<i32>} : memref<16x64xf32, #tpu.memory_space<vmem>>, vector<16x64xf32>,
    %26 = arith.subf %24, %0 : vector<16x64xf32>
    %27 = arith.mulf %26, %26 : vector<16x64xf32>
    %cst_14 = arith.constant dense<0.000000e+00> : vector<16xf32>
    %28 = vector.multi_reduction <add>, %27, %cst_14 [1] : vector<16x64xf32> to vector<16xf32>
    %29 = vector.shape_cast %28 : vector<16xf32> to vector<16x1xf32>
    %c16_i32 = arith.constant 16 : i32
    %30 = arith.muli %arg0, %c16_i32 : i32
    %31 = tpu.iota {dimensions = array<i32: 0>} : vector<16x1xi32>
    %32 = vector.broadcast %30 : i32 to vector<16x1xi32>
    %33 = arith.addi %32, %31 : vector<16x1xi32>
    %c16_i32_15 = arith.constant 16 : i32
    %34 = vector.broadcast %c16_i32_15 : i32 to vector<16x1xi32>
    %35 = arith.cmpi slt, %33, %34 : vector<16x1xi32>
    %cst_16 = arith.constant 0.000000e+00 : f32
    %36 = vector.broadcast %cst_16 : f32 to vector<16x1xf32>
    %37 = arith.select %35, %29, %36 : vector<16x1xi1>, vector<16x1xf32>
    %cst_17 = arith.constant dense<0.000000e+00> : vector<1xf32>
    %38 = vector.multi_reduction <add>, %37, %cst_17 [0] : vector<16x1xf32> to vector<1xf32>
    %39 = vector.shape_cast %38 : vector<1xf32> to vector<1x1xf32>
    %40 = vector.shape_cast %39 : vector<1x1xf32> to vector<1x1x1xf32>
    %41 = vector.shape_cast %40 : vector<1x1x1xf32> to vector<1x1x1xf32>
    %42 = vector.broadcast %41 : vector<1x1x1xf32> to vector<1x8x128xf32>
    %c0_18 = arith.constant 0 : index
    %c0_19 = arith.constant 0 : index
    %c0_20 = arith.constant 0 : index
    %43 = vector.load %arg7[%c0_18, %c0_19, %c0_20] : memref<1x8x128xf32, #tpu.memory_space<vmem>>, vector<1x8x128xf32>
    tpu.vector_store %arg7[%c0_18, %c0_19, %c0_20], %42 {strides = array<i32>} : memref<1x8x128xf32, #tpu.memory_space<vmem>>, vector<1x8x128xf32>,
    return
  }
  func.func @transform_0(%arg0: i32) -> (i32, i32) {
    %c0_i32 = arith.constant 0 : i32
    %c0_i32_0 = arith.constant 0 : i32
    return %arg0, %c0_i32 : i32, i32
  }
  func.func @transform_1(%arg0: i32) -> (i32, i32) {
    %c0_i32 = arith.constant 0 : i32
    %c0_i32_0 = arith.constant 0 : i32
    %c0_i32_1 = arith.constant 0 : i32
    return %c0_i32, %c0_i32_0 : i32, i32
  }
  func.func @transform_2(%arg0: i32) -> (i32, i32) {
    %c0_i32 = arith.constant 0 : i32
    %c0_i32_0 = arith.constant 0 : i32
    %c0_i32_1 = arith.constant 0 : i32
    return %c0_i32, %c0_i32_0 : i32, i32
  }
  func.func @transform_3(%arg0: i32) -> (i32, i32) {
    %c0_i32 = arith.constant 0 : i32
    %c0_i32_0 = arith.constant 0 : i32
    %c0_i32_1 = arith.constant 0 : i32
    return %c0_i32, %c0_i32_0 : i32, i32
  }
  func.func @transform_4(%arg0: i32) -> (i32, i32) {
    %c0_i32 = arith.constant 0 : i32
    %c0_i32_0 = arith.constant 0 : i32
    return %arg0, %c0_i32 : i32, i32
  }
  func.func @transform_5(%arg0: i32) -> (i32, i32) {
    %c0_i32 = arith.constant 0 : i32
    %c0_i32_0 = arith.constant 0 : i32
    return %arg0, %c0_i32 : i32, i32
  }
  func.func @transform_6(%arg0: i32) -> (i32, i32, i32) {
    %c0_i32 = arith.constant 0 : i32
    %c0_i32_0 = arith.constant 0 : i32
    %c0_i32_1 = arith.constant 0 : i32
    return %arg0, %c0_i32, %c0_i32_0 : i32, i32, i32
  }
}

</mosaic_0001>

<bundles_post_ra>
// kernel: squeeze.2
= control target key start
LH: loop header
LB: loop body
LE: loop exit
PB: predicated region body
PF: predicated region fallthrough
CT: control target
= control target key end

     0   :  { %s85_s0 = inlined_call_operand.vmem [shape: s32[16], index: 0, kind: input, shape index: {}]   ;;  %s86_s1 = inlined_call_operand.hbm [shape: s32[2,8], index: 1, kind: output, shape index: {}]  }
   0x1   :  { %v5_v0 = vld [vmem:[%s85_s0] sm:$0x1] }
   0x2   :  { %2 = vsyncpa [#allocation1], 0  ;;  %6 = vst [vmem:[#allocation3] sm:$0x1] %v5_v0  ;;  %vm8_vm0 = vcmask 64512   ;;  %s58_s0 = smov 120  }
   0x3   :  { %s59_s8 = smov [#allocation0]  }
   0x4   :  { %s26_s9 = sshll.u32 %s59_s8, 4  ;;  %s27_s9 = int_to_ptr.vmem [resolvable:$true] %s26_s9 }
   0x5   :  { %s34_s10 = scalar_lea.vmem %s27_s9, 32  ;;  %p39_p1 = scmp.lt.s32.totalorder %s27_s9, %s27_s9 }
   0x6   :  { %p35_p0 = scmp.ne.s32.totalorder %s27_s9, %s34_s10  ;;  %p40_p2 = scmp.lt.s32.totalorder %s34_s10, %s34_s10 }
   0x8   :  { %p41_p3 = por %p40_p2, %p39_p1 }
   0x9   :  { %v10_v1 = vld [vmem:[#allocation3] sm:$0x1]  }
   0xa   :  { %v7_v2 = vld [vmem:[#allocation3] sm:$0x1]   ;;  %11 = vrot.lane.b32.xlu0 %v10_v1, %s58_s0  ;;  %p42_p4 = pnand %p41_p3, %p35_p0 }
   0xb   :  { %9 = vst.msk [vmem:[#allocation2] sm:$0x1] %vm8_vm0, %v7_v2  }
  0x7c   :  { %v12_v3 = vpop.permute.xlu0 %11  }
  0x7d   :  { %15 = vst.msk [vmem:[#allocation2 + $0x1] sm:$0x1] %vm8_vm0, %v12_v3  }
  0x84   :  { %v19_v4 = vld [vmem:[#allocation2] sm:$0x3] }
  0x85   :  { %21 = vst [vmem:[#allocation0] sm:$0x3] %v19_v4 }
  0x86   :  { %45 = shalt.err (!%p42_p4)
}
  0x87   :  { %s46_s13 = scalar_lea.hbm %s86_s1, 32 }
  0x88   :  { %p47_p5 = scmp.ne.s32.totalorder %s86_s1, %s46_s13  ;;  %p50_p6 = scmp.lt.u32.totalorder %s46_s13, %s86_s1 }
  0x8a   :  { %p52_p7 = pnand %p50_p6, %p47_p5 }
  0x8c   :  { %55 = shalt.err (!%p52_p7)
}
  0x8d   :  { %29 = dma.vmem_to_hbm [thread:$0]  %s27_s9, 32, %s86_s1, [#allocation1]  }
  0x8e   :  { %56 = dma.done.wait [#allocation1], 32  }
  0x8f   :  { %57 = vsyncadd [#allocation1], 4294967264 }
  0x90   :  { %31 = vsyncpa [#allocation1], 1 }

// kernel: vector_quantizer.1
= control target key start
LH: loop header
LB: loop body
LE: loop exit
PB: predicated region body
PF: predicated region fallthrough
CT: control target
= control target key end

     0   :  { %v834_v7 = vmov 0.0   ;;  %s1259_s0 = inlined_call_operand.vmem [shape: f32[16,64], index: 0, kind: input, shape index: {}]   ;;  %s1260_s1 = inlined_call_operand.vmem [shape: f32[64,512], index: 1, kind: input, shape index: {}]   ;;  %s1261_s2 = inlined_call_operand.vmem [shape: f32[512,64], index: 2, kind: input, shape index: {}]   ;;  %s1262_s3 = inlined_call_operand.vmem [shape: f32[1,512], index: 3, kind: input, shape index: {}]   ;;  %s1263_s4 = inlined_call_operand.hbm [shape: f32[16,64], index: 4, kind: output, shape index: {0}]   ;;  %s1264_s5 = inlined_call_operand.vmem [shape: s32[16,1], index: 5, kind: output, shape index: {1}]   ;;  %s1265_s6 = inlined_call_operand.vmem [shape: f32[1,8,128], index: 6, kind: output, shape index: {2}]  }
   0x1   :  { %v24_v0 = vld [vmem:[%s1260_s1 + $0x8] sm:$0xff]  ;;  %v26_v2 = vld [vmem:[%s1260_s1 + $0x18] sm:$0xff]  ;;  %v23_v5 = vld [vmem:[%s1260_s1] sm:$0xff]  ;;  %127 = vmatprep.mubr.f32.mxu0 %v834_v7  ;;  %204 = vmatprep.mubr.f32.mxu1 %v834_v7 }
   0x2   :  { %v28_v1 = vld [vmem:[%s1260_s1 + $0x28] sm:$0xff]  ;;  %v30_v4 = vld [vmem:[%s1260_s1 + $0x38] sm:$0xff]  ;;  %v27_v6 = vld [vmem:[%s1260_s1 + $0x20] sm:$0xff] }
   0x3   :  { %v709_v3 = vpack.c.bf16 %v28_v1, %v24_v0  ;;  %v725_v8 = vpack.c.bf16 %v30_v4, %v26_v2  ;;  %v711_v9 = vpack.c.bf16 %v27_v6, %v23_v5  ;;  %v25_v10 = vld [vmem:[%s1260_s1 + $0x10] sm:$0xff]  ;;  %v32_v12 = vld [vmem:[%s1260_s1 + $0x48] sm:$0xff]  ;;  %v34_v15 = vld [vmem:[%s1260_s1 + $0x58] sm:$0xff] }
   0x4   :  { %v29_v11 = vld [vmem:[%s1260_s1 + $0x30] sm:$0xff]  ;;  %v36_v14 = vld [vmem:[%s1260_s1 + $0x68] sm:$0xff]  ;;  %v38_v16 = vld [vmem:[%s1260_s1 + $0x78] sm:$0xff] }
   0x5   :  { %710 = vmatprep.subr.bf16.mxu0 %v709_v3  ;;  %v727_v13 = vpack.c.bf16 %v29_v11, %v25_v10  ;;  %726 = vmatprep.subr.bf16.mxu1 %v725_v8  ;;  %v713_v17 = vpack.c.bf16 %v36_v14, %v32_v12  ;;  %v729_v18 = vpack.c.bf16 %v38_v16, %v34_v15  ;;  %v31_v19 = vld [vmem:[%s1260_s1 + $0x40] sm:$0xff]  ;;  %v33_v21 = vld [vmem:[%s1260_s1 + $0x50] sm:$0xff]  ;;  %v40_v24 = vld [vmem:[%s1260_s1 + $0x88] sm:$0xff] }
   0x6   :  { %712 = vmatpush1.bf16.msra.mxu0 %v711_v9  ;;  %v35_v20 = vld [vmem:[%s1260_s1 + $0x60] sm:$0xff]  ;;  %v37_v23 = vld [vmem:[%s1260_s1 + $0x70] sm:$0xff]  ;;  %v44_v25 = vld [vmem:[%s1260_s1 + $0xa8] sm:$0xff] }
   0x7   :  { %728 = vmatpush1.bf16.msra.mxu1 %v727_v13  ;;  %v715_v22 = vpack.c.bf16 %v35_v20, %v31_v19  ;;  %714 = vmatprep.subr.bf16.mxu0 %v713_v17  ;;  %v731_v26 = vpack.c.bf16 %v37_v23, %v33_v21  ;;  %v717_v27 = vpack.c.bf16 %v44_v25, %v40_v24  ;;  %v42_v28 = vld [vmem:[%s1260_s1 + $0x98] sm:$0xff]  ;;  %v39_v30 = vld [vmem:[%s1260_s1 + $0x80] sm:$0xff]  ;;  %v41_v33 = vld [vmem:[%s1260_s1 + $0x90] sm:$0xff] }
   0x8   :  { %730 = vmatprep.subr.bf16.mxu1 %v729_v18  ;;  %v46_v29 = vld [vmem:[%s1260_s1 + $0xb8] sm:$0xff]  ;;  %v43_v32 = vld [vmem:[%s1260_s1 + $0xa0] sm:$0xff]  ;;  %v45_v34 = vld [vmem:[%s1260_s1 + $0xb0] sm:$0xff] }
   0x9   :  { %v733_v31 = vpack.c.bf16 %v46_v29, %v42_v28  ;;  %v719_v35 = vpack.c.bf16 %v43_v32, %v39_v30  ;;  %v48_v36 = vld [vmem:[%s1260_s1 + $0xc8] sm:$0xff]  ;;  %v50_v38 = vld [vmem:[%s1260_s1 + $0xd8] sm:$0xff]  ;;  %v735_v39 = vpack.c.bf16 %v45_v34, %v41_v33  ;;  %v47_v42 = vld [vmem:[%s1260_s1 + $0xc0] sm:$0xff] }
   0xa   :  { %716 = vmatpush1.bf16.msra.mxu0 %v715_v22  ;;  %v52_v37 = vld [vmem:[%s1260_s1 + $0xe8] sm:$0xff]  ;;  %v54_v41 = vld [vmem:[%s1260_s1 + $0xf8] sm:$0xff]  ;;  %v51_v43 = vld [vmem:[%s1260_s1 + $0xe0] sm:$0xff] }
   0xb   :  { %732 = vmatpush1.bf16.msra.mxu1 %v731_v26  ;;  %718 = vmatprep.subr.bf16.mxu0 %v717_v27  ;;  %v721_v40 = vpack.c.bf16 %v52_v37, %v48_v36  ;;  %v737_v44 = vpack.c.bf16 %v54_v41, %v50_v38  ;;  %v49_v45 = vld [vmem:[%s1260_s1 + $0xd0] sm:$0xff] }
   0xc   :  { %734 = vmatprep.subr.bf16.mxu1 %v733_v31  ;;  %v53_v46 = vld [vmem:[%s1260_s1 + $0xf0] sm:$0xff] }
   0xd   :  { %12 = vsyncpa [#allocation3], 0  ;;  %v723_v47 = vpack.c.bf16 %v51_v43, %v47_v42  ;;  %v739_v48 = vpack.c.bf16 %v53_v46, %v49_v45  ;;  %v975_v49 = vld [vmem:[%s1259_s0] sm:$0xff]  ;;  %vm56_vm0 = vcmask 523264   ;;  %v985_v50 = vld [vmem:[%s1259_s0 + $0x8] sm:$0xff]  ;;  %v218_v51 = vlaneseq }
   0xe   :  { %720 = vmatpush1.bf16.msra.mxu0 %v719_v35  ;;  %v55_v54 = vld [vmem:[%s1262_s3] sm:$0xf]  ;;  %v361_v45 = vld [vmem:[%s1261_s2 + $0x88] sm:$0xff] }
   0xf   :  { %736 = vmatpush1.bf16.msra.mxu1 %v735_v39  ;;  %722 = vmatprep.subr.bf16.mxu0 %v721_v40  ;;  %v219_v52 = vshrl.u32 %v218_v51, 7  ;;  %v995_v20 = vand.u32 127, %v218_v51  ;;  %v392_v46 = vld [vmem:[%s1261_s2 + $0x180] sm:$0xff] }
  0x10   :  { %738 = vmatprep.subr.bf16.mxu1 %v737_v44  ;;  %v360_v44 = vld [vmem:[%s1261_s2 + $0x80] sm:$0xff] }
  0x11   :  { %v220_v53 = vsub.s32 0, %v219_v52  ;;  %v228_v55 = vsub.s32 2, %v219_v52  ;;  %v224_v56 = vsub.s32 1, %v219_v52  ;;  %v232_v57 = vsub.s32 3, %v219_v52  ;;  %v344_v51 = vld [vmem:[%s1261_s2] sm:$0xff]  ;;  %v345_v52 = vld [vmem:[%s1261_s2 + $0x8] sm:$0xff] }
  0x12   :  { %724 = vmatpush1.bf16.msra.mxu0 %v723_v47  ;;  %v998_v21 = vadd.s32 128, %v995_v20  ;;  %v1001_v22 = vadd.s32 256, %v995_v20  ;;  %v1004_v23 = vadd.s32 384, %v995_v20  ;;  %v741_v47 = vpack.c.bf16 %v361_v45, %v360_v44  ;;  %v353_v44 = vld [vmem:[%s1261_s2 + $0x48] sm:$0xff]  ;;  %v384_v45 = vld [vmem:[%s1261_s2 + $0x140] sm:$0xff] }
  0x13   :  { %740 = vmatpush1.bf16.msra.mxu1 %v739_v48  ;;  %v221_v58 = vrot.slane %v55_v54, %v220_v53  ;;  %v229_v59 = vrot.slane %v55_v54, %v228_v55  ;;  %v225_v60 = vrot.slane %v55_v54, %v224_v56  ;;  %v233_v61 = vrot.slane %v55_v54, %v232_v57  ;;  %v393_v48 = vld [vmem:[%s1261_s2 + $0x188] sm:$0xff]  ;;  %v376_v55 = vld [vmem:[%s1261_s2 + $0x100] sm:$0xff]  ;;  %v362_v57 = vld [vmem:[%s1261_s2 + $0x90] sm:$0xff] }
  0x14   :  { %v773_v53 = vpack.c.bf16 %v393_v48, %v392_v46  ;;  %v743_v54 = vpack.c.bf16 %v345_v52, %v344_v51  ;;  %v377_v56 = vld [vmem:[%s1261_s2 + $0x108] sm:$0xff]  ;;  %742 = vmatprep.subr.bf16.mxu0 %v741_v47  ;;  %v370_v48 = vld [vmem:[%s1261_s2 + $0xd0] sm:$0xff]  ;;  %v371_v51 = vld [vmem:[%s1261_s2 + $0xd8] sm:$0xff] }
  0x15   :  { %613 = vmatmul.mubr.msk.f32.vlgmr.msra.gmra.mrb[0].mxu0 %vm56_vm0, %v975_v49  ;;  %v385_v47 = vld [vmem:[%s1261_s2 + $0x148] sm:$0xff]  ;;  %v402_v52 = vld [vmem:[%s1261_s2 + $0x1d0] sm:$0xff] }
  0x16   :  { %615 = vmatmul.mubr.msk.f32.vlgmr.msra.gmra.mrb[0].mxu1 %vm56_vm0, %v975_v49  ;;  %133 = vmatprep.mubr.f32.mxu0 %v834_v7 }
  0x17   :  { %210 = vmatprep.mubr.f32.mxu1 %v834_v7  ;;  %774 = vmatprep.subr.bf16.mxu1 %v773_v53  ;;  %v403_v53 = vld [vmem:[%s1261_s2 + $0x1d8] sm:$0xff] }
  0x18   :  { %744 = vmatpush3.bf16.msra.mxu0 %v743_v54 }
  0x19   :  { %614 = vmatmul.mubr.msk.f32.gmra.mrb[2].mxu0 %vm56_vm0, %v985_v50 }
  0x1a   :  { %616 = vmatmul.mubr.msk.f32.gmra.mrb[2].mxu1 %vm56_vm0, %v985_v50 }
  0xe8   :  { %v129_v62 = vpop.f32.mrb[0].mxu0 }
  0xe9   :  { %v238_v63 = vsub.f32 %v129_v62, %v221_v58  ;;  %v206_v0 = vpop.f32.mrb[0].mxu1  ;;  %v131_v1 = vpop.f32.mrb[1].mxu0 }
  0xea   :  { %v240_v2 = vsub.f32 %v206_v0, %v229_v59  ;;  %v239_v3 = vsub.f32 %v131_v1, %v225_v60  ;;  %v208_v4 = vpop.f32.mrb[1].mxu1  ;;  %v346_v0 = vld [vmem:[%s1261_s2 + $0x10] sm:$0xff]  ;;  %v347_v1 = vld [vmem:[%s1261_s2 + $0x18] sm:$0xff] }
  0xeb   :  { %v241_v5 = vsub.f32 %v208_v4, %v233_v61  ;;  %v379_v4 = vld [vmem:[%s1261_s2 + $0x118] sm:$0xff] }
  0xec   :  { %v135_v6 = vpop.f32.mrb[2].mxu0  ;;  %v251_v7 = vmax.f32 %v238_v63, %v240_v2 }
  0xed   :  { %v242_v8 = vsub.f32 %v135_v6, %v221_v58  ;;  %v212_v9 = vpop.f32.mrb[2].mxu1  ;;  %v137_v10 = vpop.f32.mrb[3].mxu0  ;;  %v252_v11 = vmax.f32 %v239_v3, %v241_v5  ;;  %v775_v58 = vpack.c.bf16 %v377_v56, %v376_v55  ;;  %v365_v6 = vld [vmem:[%s1261_s2 + $0xa8] sm:$0xff]  ;;  %v791_v55 = vpack.c.bf16 %v385_v47, %v384_v45 }
  0xee   :  { %v244_v12 = vsub.f32 %v212_v9, %v229_v59  ;;  %v243_v13 = vsub.f32 %v137_v10, %v225_v60  ;;  %v214_v14 = vpop.f32.mrb[3].mxu1  ;;  %v363_v59 = vld [vmem:[%s1261_s2 + $0x98] sm:$0xff]  ;;  %v394_v60 = vld [vmem:[%s1261_s2 + $0x190] sm:$0xff]  ;;  %v396_v9 = vld [vmem:[%s1261_s2 + $0x1a0] sm:$0xff]  ;;  %v761_v56 = vpack.c.bf16 %v371_v51, %v370_v48  ;;  %v835_v45 = vmov 1.0  }
  0xef   :  { %v245_v15 = vsub.f32 %v214_v14, %v233_v61  ;;  %v253_v16 = vmax.f32 %v251_v7, %v252_v11  ;;  %v395_v61 = vld [vmem:[%s1261_s2 + $0x198] sm:$0xff]  ;;  %v745_v62 = vpack.c.bf16 %v363_v59, %v362_v57  ;;  %776 = vmatpush3.bf16.msra.mxu1 %v775_v58  ;;  %v397_v10 = vld [vmem:[%s1261_s2 + $0x1a8] sm:$0xff]  ;;  %v348_v11 = vld [vmem:[%s1261_s2 + $0x20] sm:$0xff] }
  0xf0   :  { %v256_v17 = vmax.f32 %v242_v8, %v244_v12  ;;  %v380_v14 = vld [vmem:[%s1261_s2 + $0x120] sm:$0xff]  ;;  %v354_v57 = vld [vmem:[%s1261_s2 + $0x50] sm:$0xff]  ;;  %v355_v58 = vld [vmem:[%s1261_s2 + $0x58] sm:$0xff] }
  0xf1   :  { %v257_v18 = vmax.f32 %v243_v13, %v245_v15  ;;  %254 = vmax.xlane.f32.xlu0 %v253_v16  ;;  %746 = vmatprep.subr.bf16.mxu0 %v745_v62  ;;  %v386_v59 = vld [vmem:[%s1261_s2 + $0x150] sm:$0xff]  ;;  %v372_v62 = vld [vmem:[%s1261_s2 + $0xe0] sm:$0xff] }
  0xf3   :  { %v258_v19 = vmax.f32 %v256_v17, %v257_v18  ;;  %v366_v17 = vld [vmem:[%s1261_s2 + $0xb0] sm:$0xff]  ;;  %v367_v18 = vld [vmem:[%s1261_s2 + $0xb8] sm:$0xff] }
  0xf5   :  { %259 = vmax.xlane.f32.xlu0 %v258_v19  ;;  %v398_v19 = vld [vmem:[%s1261_s2 + $0x1b0] sm:$0xff] }
 0x17e   :  { %v255_v24 = vpop.xlane.xlu0 %254 }
 0x17f   :  { %vm261_vm1 = vcmp.ge.f32.partialorder %v238_v63, %v255_v24  ;;  %vm262_vm2 = vcmp.ge.f32.partialorder %v239_v3, %v255_v24  ;;  %vm263_vm3 = vcmp.ge.f32.partialorder %v240_v2, %v255_v24  ;;  %vm264_vm4 = vcmp.ge.f32.partialorder %v241_v5, %v255_v24  ;;  %v378_v2 = vld [vmem:[%s1261_s2 + $0x110] sm:$0xff]  ;;  %v364_v5 = vld [vmem:[%s1261_s2 + $0xa0] sm:$0xff] }
 0x180   :  { %v269_v25 = vsel %vm261_vm1, %v995_v20, 512  ;;  %v270_v26 = vsel %vm262_vm2, %v998_v21, 512  ;;  %v271_v27 = vsel %vm263_vm3, %v1001_v22, 512  ;;  %v272_v28 = vsel %vm264_vm4, %v1004_v23, 512 }
 0x181   :  { %vm277_vm5 = vcmp.lt.s32.totalorder %v269_v25, %v271_v27  ;;  %vm279_vm6 = vcmp.lt.s32.totalorder %v270_v26, %v272_v28  ;;  %v777_v63 = vpack.c.bf16 %v395_v61, %v394_v60  ;;  %v747_v3 = vpack.c.bf16 %v347_v1, %v346_v0  ;;  %v387_v61 = vld [vmem:[%s1261_s2 + $0x158] sm:$0xff]  ;;  %v404_v0 = vld [vmem:[%s1261_s2 + $0x1e0] sm:$0xff]  ;;  %v405_v1 = vld [vmem:[%s1261_s2 + $0x1e8] sm:$0xff] }
 0x182   :  { %v260_v29 = vpop.xlane.xlu0 %259  ;;  %v278_v30 = vsel %vm277_vm5, %v269_v25, %v271_v27  ;;  %v280_v31 = vsel %vm279_vm6, %v270_v26, %v272_v28  ;;  %v779_v7 = vpack.c.bf16 %v379_v4, %v378_v2  ;;  %v753_v25 = vpack.c.bf16 %v367_v18, %v366_v17  ;;  %v399_v26 = vld [vmem:[%s1261_s2 + $0x1b8] sm:$0xff]  ;;  %v350_v27 = vld [vmem:[%s1261_s2 + $0x30] sm:$0xff] }
 0x183   :  { %vm265_vm7 = vcmp.ge.f32.partialorder %v242_v8, %v260_v29  ;;  %vm266_vm8 = vcmp.ge.f32.partialorder %v243_v13, %v260_v29  ;;  %vm267_vm9 = vcmp.ge.f32.partialorder %v244_v12, %v260_v29  ;;  %vm268_vm10 = vcmp.ge.f32.partialorder %v245_v15, %v260_v29  ;;  %778 = vmatprep.subr.bf16.mxu1 %v777_v63  ;;  %v349_v13 = vld [vmem:[%s1261_s2 + $0x28] sm:$0xff]  ;;  %v351_v28 = vld [vmem:[%s1261_s2 + $0x38] sm:$0xff] }
 0x184   :  { %v273_v32 = vsel %vm265_vm7, %v995_v20, 512  ;;  %v274_v33 = vsel %vm266_vm8, %v998_v21, 512  ;;  %v275_v34 = vsel %vm267_vm9, %v1001_v22, 512  ;;  %v276_v35 = vsel %vm268_vm10, %v1004_v23, 512  ;;  %v381_v15 = vld [vmem:[%s1261_s2 + $0x128] sm:$0xff]  ;;  %748 = vmatpush3.bf16.msra.mxu0 %v747_v3  ;;  %780 = vmatpush3.bf16.msra.mxu1 %v779_v7 }
 0x185   :  { %vm281_vm11 = vcmp.lt.s32.totalorder %v278_v30, %v280_v31  ;;  %vm297_vm12 = vcmp.lt.s32.totalorder %v273_v32, %v275_v34  ;;  %vm299_vm13 = vcmp.lt.s32.totalorder %v274_v33, %v276_v35  ;;  %v749_v8 = vpack.c.bf16 %v365_v6, %v364_v5  ;;  %v373_v63 = vld [vmem:[%s1261_s2 + $0xe8] sm:$0xff]  ;;  %v356_v5 = vld [vmem:[%s1261_s2 + $0x60] sm:$0xff] }
 0x186   :  { %v1014_v36 = vsel %vm281_vm11, %v278_v30, %v280_v31  ;;  %v298_v37 = vsel %vm297_vm12, %v273_v32, %v275_v34  ;;  %v300_v38 = vsel %vm299_vm13, %v274_v33, %v276_v35  ;;  %v781_v12 = vpack.c.bf16 %v397_v10, %v396_v9  ;;  %v382_v30 = vld [vmem:[%s1261_s2 + $0x130] sm:$0xff]  ;;  %v383_v31 = vld [vmem:[%s1261_s2 + $0x138] sm:$0xff]  ;;  %v368_v32 = vld [vmem:[%s1261_s2 + $0xc0] sm:$0xff] }
 0x187   :  { %v284_v39 = vshra.s32 %v1014_v36, 16  ;;  %vm301_vm14 = vcmp.lt.s32.totalorder %v298_v37, %v300_v38  ;;  %v751_v16 = vpack.c.bf16 %v349_v13, %v348_v11  ;;  %750 = vmatprep.subr.bf16.mxu0 %v749_v8  ;;  %v783_v24 = vpack.c.bf16 %v381_v15, %v380_v14  ;;  %v369_v33 = vld [vmem:[%s1261_s2 + $0xc8] sm:$0xff]  ;;  %v400_v34 = vld [vmem:[%s1261_s2 + $0x1c0] sm:$0xff] }
 0x188   :  { %v1017_v40 = vsel %vm301_vm14, %v298_v37, %v300_v38  ;;  %782 = vmatprep.subr.bf16.mxu1 %v781_v12  ;;  %v785_v29 = vpack.c.bf16 %v399_v26, %v398_v19  ;;  %v401_v35 = vld [vmem:[%s1261_s2 + $0x1c8] sm:$0xff]  ;;  %v755_v37 = vpack.c.bf16 %v351_v28, %v350_v27  ;;  %v787_v38 = vpack.c.bf16 %v383_v31, %v382_v30  ;;  %v388_v8 = vld [vmem:[%s1261_s2 + $0x160] sm:$0xff]  ;;  %v359_v26 = vld [vmem:[%s1261_s2 + $0x78] sm:$0xff] }
 0x189   :  { %v1019_v41 = vcvt.s32.f32 %v284_v39  ;;  %v304_v42 = vshra.s32 %v1017_v40, 16  ;;  %752 = vmatpush3.bf16.msra.mxu0 %v751_v16  ;;  %784 = vmatpush3.bf16.msra.mxu1 %v783_v24  ;;  %v757_v39 = vpack.c.bf16 %v369_v33, %v368_v32  ;;  %v789_v46 = vpack.c.bf16 %v401_v35, %v400_v34  ;;  %v357_v6 = vld [vmem:[%s1261_s2 + $0x68] sm:$0xff]  ;;  %v374_v24 = vld [vmem:[%s1261_s2 + $0xf0] sm:$0xff]  ;;  %v391_v30 = vld [vmem:[%s1261_s2 + $0x178] sm:$0xff] }
 0x18a   :  { %754 = vmatprep.subr.bf16.mxu0 %v753_v25  ;;  %786 = vmatprep.subr.bf16.mxu1 %v785_v29  ;;  %v793_v60 = vpack.c.bf16 %v403_v53, %v402_v52  ;;  %v763_v2 = vpack.c.bf16 %v355_v58, %v354_v57  ;;  %v795_v3 = vpack.c.bf16 %v387_v61, %v386_v59  ;;  %v389_v9 = vld [vmem:[%s1261_s2 + $0x168] sm:$0xff]  ;;  %v283_v12 = vand.u32 65535, %v1014_v36  ;;  %v375_v36 = vld [vmem:[%s1261_s2 + $0xf8] sm:$0xff]  ;;  %v390_v29 = vld [vmem:[%s1261_s2 + $0x170] sm:$0xff] }
 0x18b   :  { %287 = vmin.xlane.f32.xlu1 %v1019_v41  ;;  %v1023_v43 = vcvt.s32.f32 %v304_v42  ;;  %v352_v42 = vld [vmem:[%s1261_s2 + $0x40] sm:$0xff]  ;;  %v765_v4 = vpack.c.bf16 %v373_v63, %v372_v62  ;;  %v797_v7 = vpack.c.bf16 %v405_v1, %v404_v0  ;;  %v767_v10 = vpack.c.bf16 %v357_v6, %v356_v5  ;;  %v407_v25 = vld [vmem:[%s1261_s2 + $0x1f8] sm:$0xff] }
 0x18c   :  { %v759_v54 = vpack.c.bf16 %v353_v44, %v352_v42  ;;  %v799_v11 = vpack.c.bf16 %v389_v9, %v388_v8  ;;  %v285_v14 = vcvt.s32.f32 %v283_v12  ;;  %v303_v15 = vand.u32 65535, %v1017_v40  ;;  %v406_v40 = vld [vmem:[%s1261_s2 + $0x1f0] sm:$0xff] }
 0x18d   :  { %756 = vmatpush3.bf16.msra.mxu0 %v755_v37  ;;  %788 = vmatpush3.bf16.msra.mxu1 %v787_v38  ;;  %v801_v27 = vpack.c.bf16 %v407_v25, %v406_v40  ;;  %v803_v31 = vpack.c.bf16 %v391_v30, %v390_v29  ;;  %vm317_vm2 = vcmask 7168  }
 0x18e   :  { %758 = vmatprep.subr.bf16.mxu0 %v757_v39  ;;  %790 = vmatprep.subr.bf16.mxu1 %v789_v46  ;;  %v305_v18 = vcvt.s32.f32 %v303_v15 }
 0x18f   :  { %307 = vmin.xlane.f32.xlu1 %v1023_v43 }
 0x191   :  { %760 = vmatpush3.bf16.msra.mxu0 %v759_v54  ;;  %792 = vmatpush3.bf16.msra.mxu1 %v791_v55 }
 0x192   :  { %762 = vmatprep.subr.bf16.mxu0 %v761_v56  ;;  %794 = vmatprep.subr.bf16.mxu1 %v793_v60 }
 0x195   :  { %764 = vmatpush3.bf16.msra.mxu0 %v763_v2  ;;  %796 = vmatpush3.bf16.msra.mxu1 %v795_v3 }
 0x196   :  { %766 = vmatprep.subr.bf16.mxu0 %v765_v4  ;;  %798 = vmatprep.subr.bf16.mxu1 %v797_v7 }
 0x199   :  { %768 = vmatpush3.bf16.msra.mxu0 %v767_v10  ;;  %800 = vmatpush3.bf16.msra.mxu1 %v799_v11 }
 0x19a   :  { %802 = vmatprep.subr.bf16.mxu1 %v801_v27 }
 0x19d   :  { %804 = vmatpush3.bf16.msra.mxu1 %v803_v31 }
 0x218   :  { %v288_v13 = vpop.xlane.xlu1 %287 }
 0x219   :  { %vm289_vm15 = vcmp.eq.f32.partialorder %v1019_v41, %v288_v13  ;;  %v769_v41 = vpack.c.bf16 %v375_v36, %v374_v24  ;;  %v294_v32 = vcvt.f32.s32 %v288_v13 }
 0x21a   :  { %v290_v16 = vsel %vm289_vm15, %v285_v14, inf }
 0x21b   :  { %291 = vmin.xlane.f32.xlu0 %v290_v16  ;;  %770 = vmatprep.subr.bf16.mxu0 %v769_v41  ;;  %v295_v35 = vshll.u32 %v294_v32, 16 }
 0x21c   :  { %v308_v17 = vpop.xlane.xlu1 %307 }
 0x21d   :  { %vm309_vm1 = vcmp.eq.f32.partialorder %v1023_v43, %v308_v17  ;;  %v358_v43 = vld [vmem:[%s1261_s2 + $0x70] sm:$0xff]  ;;  %v314_v33 = vcvt.f32.s32 %v308_v17 }
 0x21e   :  { %v310_v19 = vsel %vm309_vm1, %v305_v18, inf  ;;  %v771_v28 = vpack.c.bf16 %v359_v26, %v358_v43 }
 0x21f   :  { %311 = vmin.xlane.f32.xlu1 %v310_v19  ;;  %v315_v39 = vshll.u32 %v314_v33, 16 }
 0x220   :  { %772 = vmatpush3.bf16.msra.mxu0 %v771_v28 }
 0x2a8   :  { %v292_v34 = vpop.xlane.xlu0 %291 }
 0x2a9   :  { %v293_v37 = vcvt.f32.s32 %v292_v34 }
 0x2ab   :  { %v296_v38 = vadd.s32 %v295_v35, %v293_v37 }
 0x2ac   :  { %v312_v42 = vpop.xlane.xlu1 %311 }
 0x2ad   :  { %318 = vst.msk [vmem:[%s1264_s5] sm:$0xff] %vm317_vm2, %v296_v38  ;;  %v313_v44 = vcvt.f32.s32 %v312_v42  ;;  %vm321_vm3 = vcmp.eq.s32.totalorder %v998_v21, %v296_v38  ;;  %vm323_vm4 = vcmp.eq.s32.totalorder %v1004_v23, %v296_v38  ;;  %vm320_vm5 = vcmp.eq.s32.totalorder %v995_v20, %v296_v38 }
 0x2ae   :  { %625 = vmatprep.mubr.msk.f32.mxu0 %vm321_vm3, %v835_v45  ;;  %629 = vmatprep.mubr.msk.f32.mxu1 %vm323_vm4, %v835_v45  ;;  %vm322_vm6 = vcmp.eq.s32.totalorder %v1001_v22, %v296_v38 }
 0x2af   :  { %v316_v46 = vadd.s32 %v315_v39, %v313_v44  ;;  %626 = vmatmul.mubr.msk.f32.vlgmr.msra.gmra.mrb[4].mxu0 %vm320_vm5, %v835_v45  ;;  %630 = vmatmul.mubr.msk.f32.vlgmr.msra.gmra.mrb[4].mxu1 %vm322_vm6, %v835_v45 }
 0x2b1   :  { %319 = vst.msk [vmem:[%s1264_s5 + $0x8] sm:$0xff] %vm317_vm2, %v316_v46  ;;  %vm325_vm7 = vcmp.eq.s32.totalorder %v998_v21, %v316_v46  ;;  %vm327_vm8 = vcmp.eq.s32.totalorder %v1004_v23, %v316_v46  ;;  %vm324_vm9 = vcmp.eq.s32.totalorder %v995_v20, %v316_v46  ;;  %vm326_vm10 = vcmp.eq.s32.totalorder %v1001_v22, %v316_v46  ;;  %s836_s5 = smov [#allocation2]  }
 0x2b2   :  { %627 = vmatprep.mubr.msk.f32.mxu0 %vm325_vm7, %v835_v45  ;;  %631 = vmatprep.mubr.msk.f32.mxu1 %vm327_vm8, %v835_v45  ;;  %s594_s1 = sshll.u32 %s836_s5, 4  ;;  %s595_s1 = int_to_ptr.vmem [resolvable:$true] %s594_s1 }
 0x2b3   :  { %628 = vmatmul.mubr.msk.f32.gmra.mrb[6].mxu0 %vm324_vm9, %v835_v45  ;;  %632 = vmatmul.mubr.msk.f32.gmra.mrb[6].mxu1 %vm326_vm10, %v835_v45  ;;  %s810_s15 = scalar_lea.vmem %s595_s1, 256  ;;  %p815_p1 = scmp.lt.s32.totalorder %s595_s1, %s595_s1 }
 0x2b4   :  { %p811_p0 = scmp.ne.s32.totalorder %s595_s1, %s810_s15  ;;  %p816_p2 = scmp.lt.s32.totalorder %s810_s15, %s810_s15 }
 0x2b6   :  { %p817_p3 = por %p816_p2, %p815_p1 }
 0x2b8   :  { %p818_p4 = pnand %p817_p3, %p811_p0 }
 0x382   :  { %v665_v47 = vpop.f32.mrb[4].mxu0  ;;  %v703_v48 = vpop.f32.mrb[4].mxu1 }
 0x383   :  { %v666_v51 = vpop.f32.mrb[5].mxu0  ;;  %v704_v52 = vpop.f32.mrb[5].mxu1 }
 0x384   :  { %v667_v53 = vadd.f32 %v666_v51, %v665_v47  ;;  %v705_v54 = vadd.f32 %v704_v52, %v703_v48 }
 0x386   :  { %v550_v55 = vadd.f32 %v705_v54, %v667_v53  ;;  %v668_v56 = vpop.f32.mrb[6].mxu0  ;;  %v706_v57 = vpop.f32.mrb[6].mxu1 }
 0x387   :  { %v669_v21 = vpop.f32.mrb[7].mxu0  ;;  %v707_v58 = vpop.f32.mrb[7].mxu1 }
 0x388   :  { %558 = vst.msk [vmem:[#allocation2] sm:$0xff] %vm56_vm0, %v550_v55  ;;  %v670_v20 = vadd.f32 %v669_v21, %v668_v56  ;;  %v708_v23 = vadd.f32 %v707_v58, %v706_v57  ;;  %v560_v22 = vsub.f32 %v550_v55, %v975_v49 }
 0x38a   :  { %v555_v59 = vadd.f32 %v708_v23, %v670_v20  ;;  %v562_v60 = vmul.f32 %v560_v22, %v560_v22 }
 0x38c   :  { %559 = vst.msk [vmem:[#allocation2 + $0x8] sm:$0xff] %vm56_vm0, %v555_v59  ;;  %v564_v61 = vsel %vm56_vm0, %v562_v60, 0.0  ;;  %v561_v62 = vsub.f32 %v555_v59, %v985_v50 }
 0x38d   :  { %565 = vadd.xlane.f32.xlu0 %v564_v61 }
 0x38e   :  { %v563_v63 = vmul.f32 %v561_v62, %v561_v62 }
 0x390   :  { %v567_v0 = vsel %vm56_vm0, %v563_v63, 0.0 }
 0x391   :  { %568 = vadd.xlane.f32.xlu1 %v567_v0 }
 0x392   :  { %821 = shalt.err (!%p818_p4)
}
 0x393   :  { %s822_s0 = scalar_lea.hbm %s1263_s4, 256 }
 0x394   :  { %p823_p5 = scmp.ne.s32.totalorder %s1263_s4, %s822_s0  ;;  %p826_p6 = scmp.lt.u32.totalorder %s822_s0, %s1263_s4 }
 0x396   :  { %p828_p7 = pnand %p826_p6, %p823_p5 }
 0x398   :  { %831 = shalt.err (!%p828_p7)
}
 0x399   :  { %s837_s21 = smov 128   ;;  %s838_s22 = smov 8  }
 0x39a   :  { %600 = dma.vmem_to_hbm [thread:$0]  %s595_s1, 256, %s1263_s4, [#allocation3], %s837_s21, %s837_s21, %s838_s22  }
 0x41a   :  { %v566_v49 = vpop.xlane.xlu0 %565 }
 0x41e   :  { %v569_v50 = vpop.xlane.xlu1 %568 }
 0x41f   :  { %v581_v1 = vadd.f32 %v569_v50, %v566_v49 }
 0x421   :  { %v582_v2 = vrot.slane %v581_v1, 4 }
 0x423   :  { %v583_v3 = vadd.f32 %v582_v2, %v581_v1 }
 0x425   :  { %v584_v4 = vrot.slane %v583_v3, 2 }
 0x427   :  { %v585_v5 = vadd.f32 %v584_v4, %v583_v3 }
 0x429   :  { %v586_v6 = vrot.slane %v585_v5, 1 }
 0x42b   :  { %v587_v7 = vadd.f32 %v586_v6, %v585_v5 }
 0x42d   :  { %588 = vst [vmem:[%s1265_s6] sm:$0xff] %v587_v7 }
 0x42e   :  { %832 = dma.done.wait [#allocation3], 256  }
 0x42f   :  { %833 = vsyncadd [#allocation3], 4294967040 }
 0x430   :  { %612 = vsyncpa [#allocation3], 1 }

</bundles_post_ra>
